<compile_context>
chip_gen: v6e
topology: v6e:2x2x1
jax: 0.10.0
libtpu: 0.0.40
codegen_flags: <defaults>
</compile_context>

<pallas_src>
import functools

import jax
import jax.numpy as jnp
from jax.experimental import pallas as pl
from jax.experimental.pallas import tpu as pltpu

_BN_EPS = 1e-5
_TM = 512          # max M (patch-row) tile
_TK = 512          # max K (reduction) tile
_LANE = 128        # TPU lane width


def _round_up(x, m):
    return (x + m - 1) // m * m


# ----------------------------- Pallas kernel ------------------------------- #

def _matmul_bn_kernel(*refs, relu, has_residual):
    """Tiled (M,K)@(K,Cout) with f32 accumulation and fused BN/residual/ReLU.

    Grid = (M_tiles, K_tiles), K innermost.  The accumulator lives in VMEM
    scratch; the epilogue runs only on the last K step.
    """
    if has_residual:
        p_ref, w_ref, scale_ref, shift_ref, res_ref, o_ref, acc_ref = refs
    else:
        p_ref, w_ref, scale_ref, shift_ref, o_ref, acc_ref = refs
        res_ref = None

    k = pl.program_id(1)

    @pl.when(k == 0)
    def _():
        acc_ref[...] = jnp.zeros_like(acc_ref)

    acc_ref[...] += jnp.dot(p_ref[...], w_ref[...],
                            preferred_element_type=jnp.float32)

    @pl.when(k == pl.num_programs(1) - 1)
    def _():
        y = acc_ref[...] * scale_ref[...] + shift_ref[...]
        if res_ref is not None:
            y = y + res_ref[...]
        if relu:
            y = jnp.maximum(y, 0.0)
        o_ref[...] = y.astype(o_ref.dtype)


# ------------------------------ pallas_call glue ---------------------------- #

def _conv_bn_matmul(patches, w_mat, scale, shift, residual=None, *, relu):
    """conv-as-matmul with fused eval-BN affine, optional residual add + ReLU.

    patches : (M, K)  (any float dtype; cast to bf16 for the MXU)
    w_mat   : (K, Cout)
    scale/shift : (Cout,) folded BN affine (f32)
    residual: optional (M, Cout) f32, added before the final ReLU.
    Returns (M, Cout) float32.
    """
    m, k = patches.shape
    cout = w_mat.shape[1]

    tm = min(_TM, _round_up(m, 8))
    m_pad = _round_up(m, tm)
    tk = min(_TK, _round_up(k, _LANE))
    k_pad = _round_up(k, tk)
    n_pad = _round_up(cout, _LANE)

    # Zero-pad to tile-friendly, lane-dense shapes; MXU inputs in bf16.
    p = jnp.zeros((m_pad, k_pad), jnp.bfloat16).at[:m, :k].set(
        patches.astype(jnp.bfloat16))
    w = jnp.zeros((k_pad, n_pad), jnp.bfloat16).at[:k, :cout].set(
        w_mat.astype(jnp.bfloat16))
    sc = jnp.zeros((1, n_pad), jnp.float32).at[0, :cout].set(scale)
    sh = jnp.zeros((1, n_pad), jnp.float32).at[0, :cout].set(shift)

    args = [p, w, sc, sh]
    in_specs = [
        pl.BlockSpec((tm, tk), lambda i, kk: (i, kk)),
        pl.BlockSpec((tk, n_pad), lambda i, kk: (kk, 0)),
        pl.BlockSpec((1, n_pad), lambda i, kk: (0, 0)),   # constant -> DMA'd once
        pl.BlockSpec((1, n_pad), lambda i, kk: (0, 0)),
    ]
    if residual is not None:
        r = jnp.zeros((m_pad, n_pad), jnp.float32).at[:m, :cout].set(
            residual.astype(jnp.float32))
        args.append(r)
        # Block index constant over the (innermost) K axis -> fetched once per M tile.
        in_specs.append(pl.BlockSpec((tm, n_pad), lambda i, kk: (i, 0)))

    grid = (m_pad // tm, k_pad // tk)
    kernel = functools.partial(_matmul_bn_kernel, relu=relu,
                               has_residual=residual is not None)

    flops = 2 * m_pad * k_pad * n_pad
    bytes_accessed = (m_pad * k_pad * 2 + k_pad * n_pad * 2 + m_pad * n_pad * 4
                      + (m_pad * n_pad * 4 if residual is not None else 0)
                      + 2 * n_pad * 4)

    out = pl.pallas_call(
        kernel,
        out_shape=jax.ShapeDtypeStruct((m_pad, n_pad), jnp.float32),
        grid=grid,
        in_specs=in_specs,
        out_specs=pl.BlockSpec((tm, n_pad), lambda i, kk: (i, 0)),
        scratch_shapes=[pltpu.VMEM((tm, n_pad), jnp.float32)],
        compiler_params=pltpu.CompilerParams(
            dimension_semantics=("parallel", "arbitrary"),
            vmem_limit_bytes=48 * 1024 * 1024,
        ),
        cost_estimate=pl.CostEstimate(
            flops=flops, transcendentals=0, bytes_accessed=bytes_accessed),
    )(*args)

    return out[:m, :cout]


# ------------------------------ host-side helpers --------------------------- #

def _im2col(x_nhwc, kh, kw, stride, pad):
    """Extract conv patches. Returns (N*OH*OW, kh*kw*C), OH, OW."""
    n, h, w, c = x_nhwc.shape
    xp = jnp.pad(x_nhwc, ((0, 0), (pad, pad), (pad, pad), (0, 0)))
    oh = (h + 2 * pad - kh) // stride + 1
    ow = (w + 2 * pad - kw) // stride + 1
    cols = []
    for i in range(kh):
        for j in range(kw):
            cols.append(xp[:, i:i + stride * oh:stride, j:j + stride * ow:stride, :])
    patches = jnp.stack(cols, axis=-2)                      # (N, OH, OW, kh*kw, C)
    return patches.reshape(n * oh * ow, kh * kw * c), oh, ow


def _weight_to_matrix(w_oihw):
    """PyTorch (Cout, Cin, KH, KW) -> (KH*KW*Cin, Cout) matching _im2col order."""
    cout, cin, kh, kw = w_oihw.shape
    return jnp.transpose(w_oihw, (2, 3, 1, 0)).reshape(kh * kw * cin, cout)


def _fold_bn(bn):
    gamma, beta, mean, var = bn
    scale = gamma / jnp.sqrt(var + _BN_EPS)
    shift = beta - mean * scale
    return scale, shift


def residual_block(x_nchw, params, stride):
    """Forward pass of the PyTorch ResidualBlock (eval-mode BN)."""
    x_f32 = jnp.transpose(x_nchw, (0, 2, 3, 1)).astype(jnp.float32)   # NHWC
    x_bf16 = x_f32.astype(jnp.bfloat16)   # bf16 im2col halves patch-matrix HBM traffic
    n, h, w, cin = x_f32.shape
    cout = params["w1"].shape[0]

    # left branch, conv1 3x3 stride=s, pad=1 + BN + ReLU
    p1, oh, ow = _im2col(x_bf16, 3, 3, stride, 1)
    s1, b1 = _fold_bn(params["bn1"])
    y1 = _conv_bn_matmul(p1, _weight_to_matrix(params["w1"]), s1, b1, relu=True)
    y1_img = y1.reshape(n, oh, ow, cout)

    # shortcut branch (1x1 conv + BN when shapes change, identity otherwise)
    if stride != 1 or cin != cout:
        ps, _, _ = _im2col(x_bf16, 1, 1, stride, 0)
        ss, bs = _fold_bn(params["bns"])
        res = _conv_bn_matmul(ps, _weight_to_matrix(params["ws"]), ss, bs, relu=False)
    else:
        res = x_f32.reshape(n * h * w, cin)

    # left branch, conv2 3x3 stride=1, pad=1 + BN, fused with residual add + ReLU
    p2, _, _ = _im2col(y1_img.astype(jnp.bfloat16), 3, 3, 1, 1)
    s2, b2 = _fold_bn(params["bn2"])
    out = _conv_bn_matmul(p2, _weight_to_matrix(params["w2"]), s2, b2,
                          residual=res, relu=True)

    out_img = out.reshape(n, oh, ow, cout)
    return jnp.transpose(out_img, (0, 3, 1, 2))                   # back to NCHW


# ------------------------------- pure-JAX reference ------------------------- #

def _ref_block(x, params, stride):
    def conv(x, w, s, p):
        return jax.lax.conv_general_dilated(
            x, w, (s, s), [(p, p), (p, p)],
            dimension_numbers=("NCHW", "OIHW", "NCHW"))

    def bn(x, bnp):
        g, b, m, v = bnp
        g, b, m, v = (t[None, :, None, None] for t in (g, b, m, v))
        return (x - m) / jnp.sqrt(v + _BN_EPS) * g + b

    out = jax.nn.relu(bn(conv(x, params["w1"], stride, 1), params["bn1"]))
    out = bn(conv(out, params["w2"], 1, 1), params["bn2"])
    if "ws" in params:
        sc = bn(conv(x, params["ws"], stride, 0), params["bns"])
    else:
        sc = x
    return jax.nn.relu(out + sc)


# ---------------------------------- main ------------------------------------ #

def _make_params(key, cin, cout, stride):
    ks = jax.random.split(key, 8)

    def bn_params(k):
        k1, k2, k3, k4 = jax.random.split(k, 4)
        gamma = 1.0 + 0.1 * jax.random.normal(k1, (cout,), jnp.float32)
        beta = 0.1 * jax.random.normal(k2, (cout,), jnp.float32)
        mean = 0.1 * jax.random.normal(k3, (cout,), jnp.float32)
        var = jnp.abs(jax.random.normal(k4, (cout,), jnp.float32)) + 0.5
        return (gamma, beta, mean, var)

    params = {
        "w1": 0.1 * jax.random.normal(ks[0], (cout, cin, 3, 3), jnp.float32),
        "bn1": bn_params(ks[1]),
        "w2": 0.1 * jax.random.normal(ks[2], (cout, cout, 3, 3), jnp.float32),
        "bn2": bn_params(ks[3]),
    }
    if stride != 1 or cin != cout:
        params["ws"] = 0.1 * jax.random.normal(ks[4], (cout, cin, 1, 1), jnp.float32)
        params["bns"] = bn_params(ks[5])
    return params


if __name__ == "__main__":
    N, CIN, COUT, H, W, STRIDE = 2, 4, 8, 16, 16, 2

    key = jax.random.PRNGKey(0)
    kx, kp = jax.random.split(key)
    x = jax.random.normal(kx, (N, CIN, H, W), jnp.float32)
    params = _make_params(kp, CIN, COUT, STRIDE)

    fwd = jax.jit(residual_block, static_argnums=2)
    out = jax.block_until_ready(fwd(x, params, STRIDE))

    ref = jax.block_until_ready(_ref_block(x, params, STRIDE))
    assert out.shape == ref.shape == (N, COUT, H // STRIDE, W // STRIDE), out.shape
    # bf16 MXU inputs (f32 accumulation) -> loosened tolerance vs. f32 reference.
    max_err = float(jnp.max(jnp.abs(out - ref)))
    assert jnp.allclose(out, ref, atol=5e-2, rtol=5e-2), max_err

    print("KERNEL_OK")
</pallas_src>

<mosaic_0001>
module attributes {stable_mosaic.version = 11 : i64} {
  func.func @_matmul_bn_kernel(%arg0: i32, %arg1: i32, %arg2: memref<128x128xbf16, #tpu.memory_space<vmem>>, %arg3: memref<128x128xbf16, #tpu.memory_space<vmem>>, %arg4: memref<1x128xf32, #tpu.memory_space<vmem>>, %arg5: memref<1x128xf32, #tpu.memory_space<vmem>>, %arg6: memref<128x128xf32, #tpu.memory_space<vmem>>, %arg7: memref<128x128xf32, #tpu.memory_space<vmem>>) attributes {dimension_semantics = [#tpu.dimension_semantics<parallel>, #tpu.dimension_semantics<arbitrary>], iteration_bounds = array<i64: 1, 1>, scalar_prefetch = 0 : i64, scratch_operands = 1 : i64, tpu.core_type = #tpu.core_type<tc>, window_params = [{transform_indices = @transform_0, window_bounds = array<i64: 128, 128>}, {transform_indices = @transform_1, window_bounds = array<i64: 128, 128>}, {pipeline_mode = #tpu.pipeline_mode<synchronous>, transform_indices = @transform_2, window_bounds = array<i64: 1, 128>}, {pipeline_mode = #tpu.pipeline_mode<synchronous>, transform_indices = @transform_3, window_bounds = array<i64: 1, 128>}, {transform_indices = @transform_4, window_bounds = array<i64: 128, 128>}]} {
    %c0_i32 = arith.constant 0 : i32
    %0 = arith.cmpi eq, %arg1, %c0_i32 : i32
    %1 = arith.extui %0 : i1 to i32
    %c0_i32_0 = arith.constant 0 : i32
    %2 = arith.cmpi ne, %1, %c0_i32_0 : i32
    scf.if %2 {
      %cst_10 = arith.constant 0.000000e+00 : f32
      %12 = vector.broadcast %cst_10 : f32 to vector<128x128xf32>
      %c0_11 = arith.constant 0 : index
      %c0_12 = arith.constant 0 : index
      %13 = vector.load %arg7[%c0_11, %c0_12] : memref<128x128xf32, #tpu.memory_space<vmem>>, vector<128x128xf32>
      tpu.vector_store %arg7[%c0_11, %c0_12], %12 {strides = array<i32>} : memref<128x128xf32, #tpu.memory_space<vmem>>, vector<128x128xf32>,
    } else {
    }
    %c0 = arith.constant 0 : index
    %c0_1 = arith.constant 0 : index
    %3 = vector.load %arg7[%c0, %c0_1] : memref<128x128xf32, #tpu.memory_space<vmem>>, vector<128x128xf32>
    %c0_2 = arith.constant 0 : index
    %c0_3 = arith.constant 0 : index
    %4 = vector.load %arg2[%c0_2, %c0_3] : memref<128x128xbf16, #tpu.memory_space<vmem>>, vector<128x128xbf16>
    %c0_4 = arith.constant 0 : index
    %c0_5 = arith.constant 0 : index
    %5 = vector.load %arg3[%c0_4, %c0_5] : memref<128x128xbf16, #tpu.memory_space<vmem>>, vector<128x128xbf16>
    %cst = arith.constant dense<0.000000e+00> : vector<128x128xf32>
    %6 = tpu.matmul %4, %5, %cst {dimension_numbers = #tpu.dot_dimension_numbers<[1], [0], [0], [1], [0, 0, 1, 1], [], []>} : vector<128x128xbf16>, vector<128x128xbf16>, vector<128x128xf32> -> vector<128x128xf32>
    %7 = arith.addf %3, %6 : vector<128x128xf32>
    %c0_6 = arith.constant 0 : index
    %c0_7 = arith.constant 0 : index
    %8 = vector.load %arg7[%c0_6, %c0_7] : memref<128x128xf32, #tpu.memory_space<vmem>>, vector<128x128xf32>
    tpu.vector_store %arg7[%c0_6, %c0_7], %7 {strides = array<i32>} : memref<128x128xf32, #tpu.memory_space<vmem>>, vector<128x128xf32>,
    %c0_i32_8 = arith.constant 0 : i32
    %9 = arith.cmpi eq, %arg1, %c0_i32_8 : i32
    %10 = arith.extui %9 : i1 to i32
    %c0_i32_9 = arith.constant 0 : i32
    %11 = arith.cmpi ne, %10, %c0_i32_9 : i32
    scf.if %11 {
      %c0_10 = arith.constant 0 : index
      %c0_11 = arith.constant 0 : index
      %12 = vector.load %arg7[%c0_10, %c0_11] : memref<128x128xf32, #tpu.memory_space<vmem>>, vector<128x128xf32>
      %c0_12 = arith.constant 0 : index
      %c0_13 = arith.constant 0 : index
      %13 = vector.load %arg4[%c0_12, %c0_13] : memref<1x128xf32, #tpu.memory_space<vmem>>, vector<1x128xf32>
      %14 = vector.broadcast %13 : vector<1x128xf32> to vector<128x128xf32>
      %15 = arith.mulf %12, %14 : vector<128x128xf32>
      %c0_14 = arith.constant 0 : index
      %c0_15 = arith.constant 0 : index
      %16 = vector.load %arg5[%c0_14, %c0_15] : memref<1x128xf32, #tpu.memory_space<vmem>>, vector<1x128xf32>
      %17 = vector.broadcast %16 : vector<1x128xf32> to vector<128x128xf32>
      %18 = arith.addf %15, %17 : vector<128x128xf32>
      %cst_16 = arith.constant 0.000000e+00 : f32
      %19 = vector.broadcast %cst_16 : f32 to vector<128x128xf32>
      %20 = arith.maximumf %18, %19 : vector<128x128xf32>
      %c0_17 = arith.constant 0 : index
      %c0_18 = arith.constant 0 : index
      %21 = vector.load %arg6[%c0_17, %c0_18] : memref<128x128xf32, #tpu.memory_space<vmem>>, vector<128x128xf32>
      tpu.vector_store %arg6[%c0_17, %c0_18], %20 {strides = array<i32>} : memref<128x128xf32, #tpu.memory_space<vmem>>, vector<128x128xf32>,
    } else {
    }
    return
  }
  func.func @transform_0(%arg0: i32, %arg1: i32) -> (i32, i32) {
    %c0_i32 = arith.constant 0 : i32
    return %arg0, %arg1 : i32, i32
  }
  func.func @transform_1(%arg0: i32, %arg1: i32) -> (i32, i32) {
    %c0_i32 = arith.constant 0 : i32
    %c0_i32_0 = arith.constant 0 : i32
    return %arg1, %c0_i32 : i32, i32
  }
  func.func @transform_2(%arg0: i32, %arg1: i32) -> (i32, i32) {
    %c0_i32 = arith.constant 0 : i32
    %c0_i32_0 = arith.constant 0 : i32
    %c0_i32_1 = arith.constant 0 : i32
    return %c0_i32, %c0_i32_0 : i32, i32
  }
  func.func @transform_3(%arg0: i32, %arg1: i32) -> (i32, i32) {
    %c0_i32 = arith.constant 0 : i32
    %c0_i32_0 = arith.constant 0 : i32
    %c0_i32_1 = arith.constant 0 : i32
    return %c0_i32, %c0_i32_0 : i32, i32
  }
  func.func @transform_4(%arg0: i32, %arg1: i32) -> (i32, i32) {
    %c0_i32 = arith.constant 0 : i32
    %c0_i32_0 = arith.constant 0 : i32
    return %arg0, %c0_i32 : i32, i32
  }
}

module attributes {stable_mosaic.version = 11 : i64} {
  func.func @_matmul_bn_kernel(%arg0: i32, %arg1: i32, %arg2: memref<128x128xbf16, #tpu.memory_space<vmem>>, %arg3: memref<128x128xbf16, #tpu.memory_space<vmem>>, %arg4: memref<1x128xf32, #tpu.memory_space<vmem>>, %arg5: memref<1x128xf32, #tpu.memory_space<vmem>>, %arg6: memref<128x128xf32, #tpu.memory_space<vmem>>, %arg7: memref<128x128xf32, #tpu.memory_space<vmem>>) attributes {dimension_semantics = [#tpu.dimension_semantics<parallel>, #tpu.dimension_semantics<arbitrary>], iteration_bounds = array<i64: 1, 1>, scalar_prefetch = 0 : i64, scratch_operands = 1 : i64, tpu.core_type = #tpu.core_type<tc>, window_params = [{transform_indices = @transform_0, window_bounds = array<i64: 128, 128>}, {transform_indices = @transform_1, window_bounds = array<i64: 128, 128>}, {pipeline_mode = #tpu.pipeline_mode<synchronous>, transform_indices = @transform_2, window_bounds = array<i64: 1, 128>}, {pipeline_mode = #tpu.pipeline_mode<synchronous>, transform_indices = @transform_3, window_bounds = array<i64: 1, 128>}, {transform_indices = @transform_4, window_bounds = array<i64: 128, 128>}]} {
    %c0_i32 = arith.constant 0 : i32
    %0 = arith.cmpi eq, %arg1, %c0_i32 : i32
    %1 = arith.extui %0 : i1 to i32
    %c0_i32_0 = arith.constant 0 : i32
    %2 = arith.cmpi ne, %1, %c0_i32_0 : i32
    scf.if %2 {
      %cst_10 = arith.constant 0.000000e+00 : f32
      %12 = vector.broadcast %cst_10 : f32 to vector<128x128xf32>
      %c0_11 = arith.constant 0 : index
      %c0_12 = arith.constant 0 : index
      %13 = vector.load %arg7[%c0_11, %c0_12] : memref<128x128xf32, #tpu.memory_space<vmem>>, vector<128x128xf32>
      tpu.vector_store %arg7[%c0_11, %c0_12], %12 {strides = array<i32>} : memref<128x128xf32, #tpu.memory_space<vmem>>, vector<128x128xf32>,
    } else {
    }
    %c0 = arith.constant 0 : index
    %c0_1 = arith.constant 0 : index
    %3 = vector.load %arg7[%c0, %c0_1] : memref<128x128xf32, #tpu.memory_space<vmem>>, vector<128x128xf32>
    %c0_2 = arith.constant 0 : index
    %c0_3 = arith.constant 0 : index
    %4 = vector.load %arg2[%c0_2, %c0_3] : memref<128x128xbf16, #tpu.memory_space<vmem>>, vector<128x128xbf16>
    %c0_4 = arith.constant 0 : index
    %c0_5 = arith.constant 0 : index
    %5 = vector.load %arg3[%c0_4, %c0_5] : memref<128x128xbf16, #tpu.memory_space<vmem>>, vector<128x128xbf16>
    %cst = arith.constant dense<0.000000e+00> : vector<128x128xf32>
    %6 = tpu.matmul %4, %5, %cst {dimension_numbers = #tpu.dot_dimension_numbers<[1], [0], [0], [1], [0, 0, 1, 1], [], []>} : vector<128x128xbf16>, vector<128x128xbf16>, vector<128x128xf32> -> vector<128x128xf32>
    %7 = arith.addf %3, %6 : vector<128x128xf32>
    %c0_6 = arith.constant 0 : index
    %c0_7 = arith.constant 0 : index
    %8 = vector.load %arg7[%c0_6, %c0_7] : memref<128x128xf32, #tpu.memory_space<vmem>>, vector<128x128xf32>
    tpu.vector_store %arg7[%c0_6, %c0_7], %7 {strides = array<i32>} : memref<128x128xf32, #tpu.memory_space<vmem>>, vector<128x128xf32>,
    %c0_i32_8 = arith.constant 0 : i32
    %9 = arith.cmpi eq, %arg1, %c0_i32_8 : i32
    %10 = arith.extui %9 : i1 to i32
    %c0_i32_9 = arith.constant 0 : i32
    %11 = arith.cmpi ne, %10, %c0_i32_9 : i32
    scf.if %11 {
      %c0_10 = arith.constant 0 : index
      %c0_11 = arith.constant 0 : index
      %12 = vector.load %arg7[%c0_10, %c0_11] : memref<128x128xf32, #tpu.memory_space<vmem>>, vector<128x128xf32>
      %c0_12 = arith.constant 0 : index
      %c0_13 = arith.constant 0 : index
      %13 = vector.load %arg4[%c0_12, %c0_13] : memref<1x128xf32, #tpu.memory_space<vmem>>, vector<1x128xf32>
      %14 = vector.broadcast %13 : vector<1x128xf32> to vector<128x128xf32>
      %15 = arith.mulf %12, %14 : vector<128x128xf32>
      %c0_14 = arith.constant 0 : index
      %c0_15 = arith.constant 0 : index
      %16 = vector.load %arg5[%c0_14, %c0_15] : memref<1x128xf32, #tpu.memory_space<vmem>>, vector<1x128xf32>
      %17 = vector.broadcast %16 : vector<1x128xf32> to vector<128x128xf32>
      %18 = arith.addf %15, %17 : vector<128x128xf32>
      %c0_16 = arith.constant 0 : index
      %c0_17 = arith.constant 0 : index
      %19 = vector.load %arg6[%c0_16, %c0_17] : memref<128x128xf32, #tpu.memory_space<vmem>>, vector<128x128xf32>
      tpu.vector_store %arg6[%c0_16, %c0_17], %18 {strides = array<i32>} : memref<128x128xf32, #tpu.memory_space<vmem>>, vector<128x128xf32>,
    } else {
    }
    return
  }
  func.func @transform_0(%arg0: i32, %arg1: i32) -> (i32, i32) {
    %c0_i32 = arith.constant 0 : i32
    return %arg0, %arg1 : i32, i32
  }
  func.func @transform_1(%arg0: i32, %arg1: i32) -> (i32, i32) {
    %c0_i32 = arith.constant 0 : i32
    %c0_i32_0 = arith.constant 0 : i32
    return %arg1, %c0_i32 : i32, i32
  }
  func.func @transform_2(%arg0: i32, %arg1: i32) -> (i32, i32) {
    %c0_i32 = arith.constant 0 : i32
    %c0_i32_0 = arith.constant 0 : i32
    %c0_i32_1 = arith.constant 0 : i32
    return %c0_i32, %c0_i32_0 : i32, i32
  }
  func.func @transform_3(%arg0: i32, %arg1: i32) -> (i32, i32) {
    %c0_i32 = arith.constant 0 : i32
    %c0_i32_0 = arith.constant 0 : i32
    %c0_i32_1 = arith.constant 0 : i32
    return %c0_i32, %c0_i32_0 : i32, i32
  }
  func.func @transform_4(%arg0: i32, %arg1: i32) -> (i32, i32) {
    %c0_i32 = arith.constant 0 : i32
    %c0_i32_0 = arith.constant 0 : i32
    return %arg0, %c0_i32 : i32, i32
  }
}

module attributes {stable_mosaic.version = 11 : i64} {
  func.func @_matmul_bn_kernel(%arg0: i32, %arg1: i32, %arg2: memref<128x128xbf16, #tpu.memory_space<vmem>>, %arg3: memref<128x128xbf16, #tpu.memory_space<vmem>>, %arg4: memref<1x128xf32, #tpu.memory_space<vmem>>, %arg5: memref<1x128xf32, #tpu.memory_space<vmem>>, %arg6: memref<128x128xf32, #tpu.memory_space<vmem>>, %arg7: memref<128x128xf32, #tpu.memory_space<vmem>>, %arg8: memref<128x128xf32, #tpu.memory_space<vmem>>) attributes {dimension_semantics = [#tpu.dimension_semantics<parallel>, #tpu.dimension_semantics<arbitrary>], iteration_bounds = array<i64: 1, 1>, scalar_prefetch = 0 : i64, scratch_operands = 1 : i64, tpu.core_type = #tpu.core_type<tc>, window_params = [{transform_indices = @transform_0, window_bounds = array<i64: 128, 128>}, {transform_indices = @transform_1, window_bounds = array<i64: 128, 128>}, {pipeline_mode = #tpu.pipeline_mode<synchronous>, transform_indices = @transform_2, window_bounds = array<i64: 1, 128>}, {pipeline_mode = #tpu.pipeline_mode<synchronous>, transform_indices = @transform_3, window_bounds = array<i64: 1, 128>}, {transform_indices = @transform_4, window_bounds = array<i64: 128, 128>}, {transform_indices = @transform_5, window_bounds = array<i64: 128, 128>}]} {
    %c0_i32 = arith.constant 0 : i32
    %0 = arith.cmpi eq, %arg1, %c0_i32 : i32
    %1 = arith.extui %0 : i1 to i32
    %c0_i32_0 = arith.constant 0 : i32
    %2 = arith.cmpi ne, %1, %c0_i32_0 : i32
    scf.if %2 {
      %cst_10 = arith.constant 0.000000e+00 : f32
      %12 = vector.broadcast %cst_10 : f32 to vector<128x128xf32>
      %c0_11 = arith.constant 0 : index
      %c0_12 = arith.constant 0 : index
      %13 = vector.load %arg8[%c0_11, %c0_12] : memref<128x128xf32, #tpu.memory_space<vmem>>, vector<128x128xf32>
      tpu.vector_store %arg8[%c0_11, %c0_12], %12 {strides = array<i32>} : memref<128x128xf32, #tpu.memory_space<vmem>>, vector<128x128xf32>,
    } else {
    }
    %c0 = arith.constant 0 : index
    %c0_1 = arith.constant 0 : index
    %3 = vector.load %arg8[%c0, %c0_1] : memref<128x128xf32, #tpu.memory_space<vmem>>, vector<128x128xf32>
    %c0_2 = arith.constant 0 : index
    %c0_3 = arith.constant 0 : index
    %4 = vector.load %arg2[%c0_2, %c0_3] : memref<128x128xbf16, #tpu.memory_space<vmem>>, vector<128x128xbf16>
    %c0_4 = arith.constant 0 : index
    %c0_5 = arith.constant 0 : index
    %5 = vector.load %arg3[%c0_4, %c0_5] : memref<128x128xbf16, #tpu.memory_space<vmem>>, vector<128x128xbf16>
    %cst = arith.constant dense<0.000000e+00> : vector<128x128xf32>
    %6 = tpu.matmul %4, %5, %cst {dimension_numbers = #tpu.dot_dimension_numbers<[1], [0], [0], [1], [0, 0, 1, 1], [], []>} : vector<128x128xbf16>, vector<128x128xbf16>, vector<128x128xf32> -> vector<128x128xf32>
    %7 = arith.addf %3, %6 : vector<128x128xf32>
    %c0_6 = arith.constant 0 : index
    %c0_7 = arith.constant 0 : index
    %8 = vector.load %arg8[%c0_6, %c0_7] : memref<128x128xf32, #tpu.memory_space<vmem>>, vector<128x128xf32>
    tpu.vector_store %arg8[%c0_6, %c0_7], %7 {strides = array<i32>} : memref<128x128xf32, #tpu.memory_space<vmem>>, vector<128x128xf32>,
    %c0_i32_8 = arith.constant 0 : i32
    %9 = arith.cmpi eq, %arg1, %c0_i32_8 : i32
    %10 = arith.extui %9 : i1 to i32
    %c0_i32_9 = arith.constant 0 : i32
    %11 = arith.cmpi ne, %10, %c0_i32_9 : i32
    scf.if %11 {
      %c0_10 = arith.constant 0 : index
      %c0_11 = arith.constant 0 : index
      %12 = vector.load %arg8[%c0_10, %c0_11] : memref<128x128xf32, #tpu.memory_space<vmem>>, vector<128x128xf32>
      %c0_12 = arith.constant 0 : index
      %c0_13 = arith.constant 0 : index
      %13 = vector.load %arg4[%c0_12, %c0_13] : memref<1x128xf32, #tpu.memory_space<vmem>>, vector<1x128xf32>
      %14 = vector.broadcast %13 : vector<1x128xf32> to vector<128x128xf32>
      %15 = arith.mulf %12, %14 : vector<128x128xf32>
      %c0_14 = arith.constant 0 : index
      %c0_15 = arith.constant 0 : index
      %16 = vector.load %arg5[%c0_14, %c0_15] : memref<1x128xf32, #tpu.memory_space<vmem>>, vector<1x128xf32>
      %17 = vector.broadcast %16 : vector<1x128xf32> to vector<128x128xf32>
      %18 = arith.addf %15, %17 : vector<128x128xf32>
      %c0_16 = arith.constant 0 : index
      %c0_17 = arith.constant 0 : index
      %19 = vector.load %arg6[%c0_16, %c0_17] : memref<128x128xf32, #tpu.memory_space<vmem>>, vector<128x128xf32>
      %20 = arith.addf %18, %19 : vector<128x128xf32>
      %cst_18 = arith.constant 0.000000e+00 : f32
      %21 = vector.broadcast %cst_18 : f32 to vector<128x128xf32>
      %22 = arith.maximumf %20, %21 : vector<128x128xf32>
      %c0_19 = arith.constant 0 : index
      %c0_20 = arith.constant 0 : index
      %23 = vector.load %arg7[%c0_19, %c0_20] : memref<128x128xf32, #tpu.memory_space<vmem>>, vector<128x128xf32>
      tpu.vector_store %arg7[%c0_19, %c0_20], %22 {strides = array<i32>} : memref<128x128xf32, #tpu.memory_space<vmem>>, vector<128x128xf32>,
    } else {
    }
    return
  }
  func.func @transform_0(%arg0: i32, %arg1: i32) -> (i32, i32) {
    %c0_i32 = arith.constant 0 : i32
    return %arg0, %arg1 : i32, i32
  }
  func.func @transform_1(%arg0: i32, %arg1: i32) -> (i32, i32) {
    %c0_i32 = arith.constant 0 : i32
    %c0_i32_0 = arith.constant 0 : i32
    return %arg1, %c0_i32 : i32, i32
  }
  func.func @transform_2(%arg0: i32, %arg1: i32) -> (i32, i32) {
    %c0_i32 = arith.constant 0 : i32
    %c0_i32_0 = arith.constant 0 : i32
    %c0_i32_1 = arith.constant 0 : i32
    return %c0_i32, %c0_i32_0 : i32, i32
  }
  func.func @transform_3(%arg0: i32, %arg1: i32) -> (i32, i32) {
    %c0_i32 = arith.constant 0 : i32
    %c0_i32_0 = arith.constant 0 : i32
    %c0_i32_1 = arith.constant 0 : i32
    return %c0_i32, %c0_i32_0 : i32, i32
  }
  func.func @transform_4(%arg0: i32, %arg1: i32) -> (i32, i32) {
    %c0_i32 = arith.constant 0 : i32
    %c0_i32_0 = arith.constant 0 : i32
    return %arg0, %c0_i32 : i32, i32
  }
  func.func @transform_5(%arg0: i32, %arg1: i32) -> (i32, i32) {
    %c0_i32 = arith.constant 0 : i32
    %c0_i32_0 = arith.constant 0 : i32
    return %arg0, %c0_i32 : i32, i32
  }
}

</mosaic_0001>

<bundles_post_ra>
// kernel: residual_block.3
= control target key start
LH: loop header
LB: loop body
LE: loop exit
PB: predicated region body
PF: predicated region fallthrough
CT: control target
= control target key end

     0   :  { %s673_s1 = inlined_call_operand.vmem [shape: bf16[128,128], index: 1, kind: input, shape index: {}]   ;;  %s674_s0 = inlined_call_operand.vmem [shape: bf16[128,128], index: 0, kind: input, shape index: {}]   ;;  %s675_s2 = inlined_call_operand.vmem [shape: f32[1,128], index: 2, kind: input, shape index: {}]   ;;  %s676_s3 = inlined_call_operand.vmem [shape: f32[1,128], index: 3, kind: input, shape index: {}]   ;;  %s677_s4 = inlined_call_operand.vmem [shape: f32[128,128], index: 4, kind: output, shape index: {}]  }
   0x1   :  { %v494_v0 = vld [vmem:[%s673_s1 + $0x38] sm:$0xff]   ;;  %v495_v1 = vld [vmem:[%s673_s1 + $0x30] sm:$0xff]   ;;  %v496_v2 = vld [vmem:[%s673_s1 + $0x28] sm:$0xff]  }
   0x2   :  { %446 = vmatprep.subr.bf16.mxu0 %v494_v0  ;;  %478 = vmatprep.subr.bf16.mxu1 %v494_v0  ;;  %v497_v3 = vld [vmem:[%s673_s1 + $0x20] sm:$0xff]   ;;  %v498_v6 = vld [vmem:[%s673_s1 + $0x18] sm:$0xff]   ;;  %v499_v7 = vld [vmem:[%s673_s1 + $0x10] sm:$0xff]  }
   0x3   :  { %447 = vmatpush3.bf16.msra.mxu0 %v494_v0  ;;  %486 = vmatpush3.bf16.msra.mxu1 %v494_v0  ;;  %v502_v4 = vld [vmem:[%s674_s0] sm:$0xff]   ;;  %v500_v8 = vld [vmem:[%s673_s1 + $0x8] sm:$0xff]   ;;  %v506_v12 = vld [vmem:[%s674_s0 + $0x10] sm:$0xff]  }
   0x4   :  { %448 = vmatprep.subr.bf16.mxu0 %v495_v1  ;;  %479 = vmatprep.subr.bf16.mxu1 %v495_v1  ;;  %v503_v5 = vld [vmem:[%s674_s0 + $0x20] sm:$0xff]   ;;  %v504_v10 = vld [vmem:[%s674_s0 + $0x8] sm:$0xff]   ;;  %v507_v13 = vld [vmem:[%s674_s0 + $0x30] sm:$0xff]  }
   0x5   :  { %462 = vmatprep.mubr.bf16.mxu0 %v502_v4  ;;  %470 = vmatprep.mubr.bf16.mxu1 %v503_v5  ;;  %v501_v9 = vld [vmem:[%s673_s1] sm:$0xff]   ;;  %v505_v11 = vld [vmem:[%s674_s0 + $0x28] sm:$0xff]   ;;  %v508_v14 = vld [vmem:[%s674_s0 + $0x18] sm:$0xff]  }
   0x6   :  { %v509_v15 = vld [vmem:[%s674_s0 + $0x38] sm:$0xff]   ;;  %v586_v16 = vld [vmem:[%s675_s2] ss:$0 sm:$0xff] }
   0x7   :  { %449 = vmatpush3.bf16.msra.mxu0 %v495_v1  ;;  %487 = vmatpush3.bf16.msra.mxu1 %v495_v1  ;;  %v591_v18 = vld [vmem:[%s676_s3] ss:$0 sm:$0xff] }
   0x8   :  { %450 = vmatprep.subr.bf16.mxu0 %v496_v2  ;;  %480 = vmatprep.subr.bf16.mxu1 %v496_v2 }
   0xb   :  { %451 = vmatpush3.bf16.msra.mxu0 %v496_v2  ;;  %488 = vmatpush3.bf16.msra.mxu1 %v496_v2 }
   0xc   :  { %452 = vmatprep.subr.bf16.mxu0 %v497_v3  ;;  %481 = vmatprep.subr.bf16.mxu1 %v497_v3 }
   0xf   :  { %453 = vmatpush3.bf16.msra.mxu0 %v497_v3  ;;  %489 = vmatpush3.bf16.msra.mxu1 %v497_v3 }
  0x10   :  { %454 = vmatprep.subr.bf16.mxu0 %v498_v6  ;;  %482 = vmatprep.subr.bf16.mxu1 %v498_v6 }
  0x13   :  { %455 = vmatpush3.bf16.msra.mxu0 %v498_v6  ;;  %490 = vmatpush3.bf16.msra.mxu1 %v498_v6 }
  0x14   :  { %456 = vmatprep.subr.bf16.mxu0 %v499_v7  ;;  %483 = vmatprep.subr.bf16.mxu1 %v499_v7 }
  0x17   :  { %457 = vmatpush3.bf16.msra.mxu0 %v499_v7  ;;  %491 = vmatpush3.bf16.msra.mxu1 %v499_v7 }
  0x18   :  { %458 = vmatprep.subr.bf16.mxu0 %v500_v8  ;;  %484 = vmatprep.subr.bf16.mxu1 %v500_v8 }
  0x1b   :  { %459 = vmatpush3.bf16.msra.mxu0 %v500_v8  ;;  %492 = vmatpush3.bf16.msra.mxu1 %v500_v8 }
  0x1c   :  { %460 = vmatprep.subr.bf16.mxu0 %v501_v9  ;;  %485 = vmatprep.subr.bf16.mxu1 %v501_v9 }
  0x1f   :  { %461 = vmatpush3.bf16.msra.mxu0 %v501_v9  ;;  %493 = vmatpush3.bf16.msra.mxu1 %v501_v9 }
  0x22   :  { %463 = vmatmul.mubr.bf16.vlgmr.msra.gmra.mxu0 %v504_v10  ;;  %471 = vmatmul.mubr.bf16.vlgmr.msra.gmra.mxu1 %v505_v11 }
  0x23   :  { %466 = vmatprep.mubr.bf16.mxu0 %v506_v12  ;;  %474 = vmatprep.mubr.bf16.mxu1 %v507_v13 }
  0x2a   :  { %467 = vmatmul.mubr.bf16.gmra.mxu0 %v508_v14  ;;  %475 = vmatmul.mubr.bf16.gmra.mxu1 %v509_v15 }
  0xe2   :  { %v464_v17 = vpop.f32.mrf.mxu0  ;;  %v472_v19 = vpop.f32.mrf.mxu1 }
  0xe3   :  { %v339_v20 = vmul.f32 %v464_v17, %v586_v16  ;;  %v347_v21 = vmul.f32 %v472_v19, %v586_v16 }
  0xe4   :  { %v216_v22 = vpop.f32.mrf.mxu0  ;;  %v248_v23 = vpop.f32.mrf.mxu1 }
  0xe5   :  { %v362_v24 = vadd.f32 %v591_v18, %v339_v20  ;;  %v370_v25 = vadd.f32 %v591_v18, %v347_v21  ;;  %v337_v26 = vmul.f32 %v586_v16, %v216_v22  ;;  %v345_v27 = vmul.f32 %v586_v16, %v248_v23 }
  0xe6   :  { %v465_v28 = vpop.f32.mrf.mxu0  ;;  %v473_v29 = vpop.f32.mrf.mxu1 }
  0xe7   :  { %v378_v30 = vmax.f32 %v362_v24, 0.0  ;;  %v386_v31 = vmax.f32 %v370_v25, 0.0  ;;  %v360_v32 = vadd.f32 %v591_v18, %v337_v26  ;;  %v368_v33 = vadd.f32 %v591_v18, %v345_v27 }
  0xe8   :  { %v340_v34 = vmul.f32 %v465_v28, %v586_v16  ;;  %v348_v35 = vmul.f32 %v473_v29, %v586_v16  ;;  %v219_v36 = vpop.f32.mrf.mxu0  ;;  %v251_v37 = vpop.f32.mrf.mxu1 }
  0xe9   :  { %394 = vst [vmem:[%s677_s4 + $0x10] sm:$0xff] %v378_v30  ;;  %402 = vst [vmem:[%s677_s4 + $0x50] sm:$0xff] %v386_v31  ;;  %v376_v38 = vmax.f32 %v360_v32, 0.0  ;;  %v384_v39 = vmax.f32 %v368_v33, 0.0  ;;  %v338_v40 = vmul.f32 %v586_v16, %v219_v36  ;;  %v346_v41 = vmul.f32 %v586_v16, %v251_v37 }
  0xea   :  { %v363_v42 = vadd.f32 %v591_v18, %v340_v34  ;;  %v371_v43 = vadd.f32 %v591_v18, %v348_v35  ;;  %v468_v44 = vpop.f32.mrf.mxu0  ;;  %v476_v45 = vpop.f32.mrf.mxu1 }
  0xeb   :  { %392 = vst [vmem:[%s677_s4] sm:$0xff] %v376_v38  ;;  %400 = vst [vmem:[%s677_s4 + $0x40] sm:$0xff] %v384_v39  ;;  %v361_v46 = vadd.f32 %v591_v18, %v338_v40  ;;  %v369_v47 = vadd.f32 %v591_v18, %v346_v41  ;;  %v343_v48 = vmul.f32 %v468_v44, %v586_v16 }
  0xec   :  { %v351_v49 = vmul.f32 %v476_v45, %v586_v16  ;;  %v379_v50 = vmax.f32 %v363_v42, 0.0  ;;  %v387_v51 = vmax.f32 %v371_v43, 0.0  ;;  %v232_v52 = vpop.f32.mrf.mxu0  ;;  %v264_v53 = vpop.f32.mrf.mxu1 }
  0xed   :  { %v377_v54 = vmax.f32 %v361_v46, 0.0  ;;  %v385_v55 = vmax.f32 %v369_v47, 0.0  ;;  %v366_v56 = vadd.f32 %v591_v18, %v343_v48  ;;  %v341_v58 = vmul.f32 %v586_v16, %v232_v52 }
  0xee   :  { %v374_v57 = vadd.f32 %v591_v18, %v351_v49  ;;  %395 = vst [vmem:[%s677_s4 + $0x18] sm:$0xff] %v379_v50  ;;  %403 = vst [vmem:[%s677_s4 + $0x58] sm:$0xff] %v387_v51  ;;  %v349_v59 = vmul.f32 %v586_v16, %v264_v53  ;;  %v469_v60 = vpop.f32.mrf.mxu0  ;;  %v477_v61 = vpop.f32.mrf.mxu1 }
  0xef   :  { %393 = vst [vmem:[%s677_s4 + $0x8] sm:$0xff] %v377_v54  ;;  %401 = vst [vmem:[%s677_s4 + $0x48] sm:$0xff] %v385_v55  ;;  %v382_v62 = vmax.f32 %v366_v56, 0.0  ;;  %v344_v0 = vmul.f32 %v469_v60, %v586_v16  ;;  %v352_v1 = vmul.f32 %v477_v61, %v586_v16  ;;  %v364_v2 = vadd.f32 %v591_v18, %v341_v58 }
  0xf0   :  { %v390_v63 = vmax.f32 %v374_v57, 0.0  ;;  %v372_v3 = vadd.f32 %v591_v18, %v349_v59  ;;  %v235_v4 = vpop.f32.mrf.mxu0  ;;  %v267_v5 = vpop.f32.mrf.mxu1 }
  0xf1   :  { %398 = vst [vmem:[%s677_s4 + $0x30] sm:$0xff] %v382_v62  ;;  %v367_v6 = vadd.f32 %v591_v18, %v344_v0  ;;  %v375_v7 = vadd.f32 %v591_v18, %v352_v1  ;;  %v342_v8 = vmul.f32 %v586_v16, %v235_v4  ;;  %v350_v9 = vmul.f32 %v586_v16, %v267_v5 }
  0xf2   :  { %406 = vst [vmem:[%s677_s4 + $0x70] sm:$0xff] %v390_v63  ;;  %v380_v10 = vmax.f32 %v364_v2, 0.0  ;;  %v388_v11 = vmax.f32 %v372_v3, 0.0 }
  0xf3   :  { %v383_v12 = vmax.f32 %v367_v6, 0.0  ;;  %v391_v13 = vmax.f32 %v375_v7, 0.0  ;;  %v365_v14 = vadd.f32 %v591_v18, %v342_v8  ;;  %v373_v15 = vadd.f32 %v591_v18, %v350_v9 }
  0xf4   :  { %396 = vst [vmem:[%s677_s4 + $0x20] sm:$0xff] %v380_v10  ;;  %404 = vst [vmem:[%s677_s4 + $0x60] sm:$0xff] %v388_v11 }
  0xf5   :  { %399 = vst [vmem:[%s677_s4 + $0x38] sm:$0xff] %v383_v12  ;;  %407 = vst [vmem:[%s677_s4 + $0x78] sm:$0xff] %v391_v13  ;;  %v381_v16 = vmax.f32 %v365_v14, 0.0  ;;  %v389_v17 = vmax.f32 %v373_v15, 0.0 }
  0xf7   :  { %397 = vst [vmem:[%s677_s4 + $0x28] sm:$0xff] %v381_v16  ;;  %405 = vst [vmem:[%s677_s4 + $0x68] sm:$0xff] %v389_v17 }

// kernel: residual_block.4
= control target key start
LH: loop header
LB: loop body
LE: loop exit
PB: predicated region body
PF: predicated region fallthrough
CT: control target
= control target key end

     0   :  { %s621_s1 = inlined_call_operand.vmem [shape: bf16[128,128], index: 1, kind: input, shape index: {}]   ;;  %s622_s0 = inlined_call_operand.vmem [shape: bf16[128,128], index: 0, kind: input, shape index: {}]   ;;  %s623_s2 = inlined_call_operand.vmem [shape: f32[1,128], index: 2, kind: input, shape index: {}]   ;;  %s624_s3 = inlined_call_operand.vmem [shape: f32[1,128], index: 3, kind: input, shape index: {}]   ;;  %s625_s4 = inlined_call_operand.vmem [shape: f32[128,128], index: 4, kind: output, shape index: {}]  }
   0x1   :  { %v478_v0 = vld [vmem:[%s621_s1 + $0x38] sm:$0xff]   ;;  %v479_v1 = vld [vmem:[%s621_s1 + $0x30] sm:$0xff]   ;;  %v480_v2 = vld [vmem:[%s621_s1 + $0x28] sm:$0xff]  }
   0x2   :  { %430 = vmatprep.subr.bf16.mxu0 %v478_v0  ;;  %462 = vmatprep.subr.bf16.mxu1 %v478_v0  ;;  %v481_v3 = vld [vmem:[%s621_s1 + $0x20] sm:$0xff]   ;;  %v482_v6 = vld [vmem:[%s621_s1 + $0x18] sm:$0xff]   ;;  %v483_v7 = vld [vmem:[%s621_s1 + $0x10] sm:$0xff]  }
   0x3   :  { %431 = vmatpush3.bf16.msra.mxu0 %v478_v0  ;;  %470 = vmatpush3.bf16.msra.mxu1 %v478_v0  ;;  %v486_v4 = vld [vmem:[%s622_s0] sm:$0xff]   ;;  %v484_v8 = vld [vmem:[%s621_s1 + $0x8] sm:$0xff]   ;;  %v490_v12 = vld [vmem:[%s622_s0 + $0x10] sm:$0xff]  }
   0x4   :  { %432 = vmatprep.subr.bf16.mxu0 %v479_v1  ;;  %463 = vmatprep.subr.bf16.mxu1 %v479_v1  ;;  %v487_v5 = vld [vmem:[%s622_s0 + $0x20] sm:$0xff]   ;;  %v488_v10 = vld [vmem:[%s622_s0 + $0x8] sm:$0xff]   ;;  %v491_v13 = vld [vmem:[%s622_s0 + $0x30] sm:$0xff]  }
   0x5   :  { %446 = vmatprep.mubr.bf16.mxu0 %v486_v4  ;;  %454 = vmatprep.mubr.bf16.mxu1 %v487_v5  ;;  %v485_v9 = vld [vmem:[%s621_s1] sm:$0xff]   ;;  %v489_v11 = vld [vmem:[%s622_s0 + $0x28] sm:$0xff]   ;;  %v492_v14 = vld [vmem:[%s622_s0 + $0x18] sm:$0xff]  }
   0x6   :  { %v493_v15 = vld [vmem:[%s622_s0 + $0x38] sm:$0xff]   ;;  %v412_v16 = vld [vmem:[%s623_s2] ss:$0 sm:$0xff] }
   0x7   :  { %433 = vmatpush3.bf16.msra.mxu0 %v479_v1  ;;  %471 = vmatpush3.bf16.msra.mxu1 %v479_v1  ;;  %v413_v18 = vld [vmem:[%s624_s3] ss:$0 sm:$0xff] }
   0x8   :  { %434 = vmatprep.subr.bf16.mxu0 %v480_v2  ;;  %464 = vmatprep.subr.bf16.mxu1 %v480_v2 }
   0xb   :  { %435 = vmatpush3.bf16.msra.mxu0 %v480_v2  ;;  %472 = vmatpush3.bf16.msra.mxu1 %v480_v2 }
   0xc   :  { %436 = vmatprep.subr.bf16.mxu0 %v481_v3  ;;  %465 = vmatprep.subr.bf16.mxu1 %v481_v3 }
   0xf   :  { %437 = vmatpush3.bf16.msra.mxu0 %v481_v3  ;;  %473 = vmatpush3.bf16.msra.mxu1 %v481_v3 }
  0x10   :  { %438 = vmatprep.subr.bf16.mxu0 %v482_v6  ;;  %466 = vmatprep.subr.bf16.mxu1 %v482_v6 }
  0x13   :  { %439 = vmatpush3.bf16.msra.mxu0 %v482_v6  ;;  %474 = vmatpush3.bf16.msra.mxu1 %v482_v6 }
  0x14   :  { %440 = vmatprep.subr.bf16.mxu0 %v483_v7  ;;  %467 = vmatprep.subr.bf16.mxu1 %v483_v7 }
  0x17   :  { %441 = vmatpush3.bf16.msra.mxu0 %v483_v7  ;;  %475 = vmatpush3.bf16.msra.mxu1 %v483_v7 }
  0x18   :  { %442 = vmatprep.subr.bf16.mxu0 %v484_v8  ;;  %468 = vmatprep.subr.bf16.mxu1 %v484_v8 }
  0x1b   :  { %443 = vmatpush3.bf16.msra.mxu0 %v484_v8  ;;  %476 = vmatpush3.bf16.msra.mxu1 %v484_v8 }
  0x1c   :  { %444 = vmatprep.subr.bf16.mxu0 %v485_v9  ;;  %469 = vmatprep.subr.bf16.mxu1 %v485_v9 }
  0x1f   :  { %445 = vmatpush3.bf16.msra.mxu0 %v485_v9  ;;  %477 = vmatpush3.bf16.msra.mxu1 %v485_v9 }
  0x22   :  { %447 = vmatmul.mubr.bf16.vlgmr.msra.gmra.mxu0 %v488_v10  ;;  %455 = vmatmul.mubr.bf16.vlgmr.msra.gmra.mxu1 %v489_v11 }
  0x23   :  { %450 = vmatprep.mubr.bf16.mxu0 %v490_v12  ;;  %458 = vmatprep.mubr.bf16.mxu1 %v491_v13 }
  0x2a   :  { %451 = vmatmul.mubr.bf16.gmra.mxu0 %v492_v14  ;;  %459 = vmatmul.mubr.bf16.gmra.mxu1 %v493_v15 }
  0xe2   :  { %v448_v17 = vpop.f32.mrf.mxu0  ;;  %v456_v19 = vpop.f32.mrf.mxu1 }
  0xe3   :  { %v339_v20 = vmul.f32 %v448_v17, %v412_v16  ;;  %v347_v21 = vmul.f32 %v456_v19, %v412_v16 }
  0xe4   :  { %v216_v22 = vpop.f32.mrf.mxu0  ;;  %v248_v23 = vpop.f32.mrf.mxu1 }
  0xe5   :  { %v362_v24 = vadd.f32 %v413_v18, %v339_v20  ;;  %v370_v25 = vadd.f32 %v413_v18, %v347_v21  ;;  %v337_v26 = vmul.f32 %v412_v16, %v216_v22  ;;  %v345_v27 = vmul.f32 %v412_v16, %v248_v23 }
  0xe6   :  { %v449_v28 = vpop.f32.mrf.mxu0  ;;  %v457_v29 = vpop.f32.mrf.mxu1 }
  0xe7   :  { %378 = vst [vmem:[%s625_s4 + $0x10] sm:$0xff] %v362_v24  ;;  %386 = vst [vmem:[%s625_s4 + $0x50] sm:$0xff] %v370_v25  ;;  %v360_v30 = vadd.f32 %v413_v18, %v337_v26  ;;  %v368_v31 = vadd.f32 %v413_v18, %v345_v27  ;;  %v340_v32 = vmul.f32 %v449_v28, %v412_v16 }
  0xe8   :  { %v348_v33 = vmul.f32 %v457_v29, %v412_v16  ;;  %v219_v34 = vpop.f32.mrf.mxu0  ;;  %v251_v35 = vpop.f32.mrf.mxu1 }
  0xe9   :  { %376 = vst [vmem:[%s625_s4] sm:$0xff] %v360_v30  ;;  %384 = vst [vmem:[%s625_s4 + $0x40] sm:$0xff] %v368_v31  ;;  %v363_v36 = vadd.f32 %v413_v18, %v340_v32  ;;  %v338_v38 = vmul.f32 %v412_v16, %v219_v34  ;;  %v346_v39 = vmul.f32 %v412_v16, %v251_v35 }
  0xea   :  { %v371_v37 = vadd.f32 %v413_v18, %v348_v33  ;;  %v452_v40 = vpop.f32.mrf.mxu0  ;;  %v460_v41 = vpop.f32.mrf.mxu1 }
  0xeb   :  { %379 = vst [vmem:[%s625_s4 + $0x18] sm:$0xff] %v363_v36  ;;  %v361_v42 = vadd.f32 %v413_v18, %v338_v38  ;;  %v369_v43 = vadd.f32 %v413_v18, %v346_v39  ;;  %v343_v44 = vmul.f32 %v452_v40, %v412_v16  ;;  %v351_v45 = vmul.f32 %v460_v41, %v412_v16 }
  0xec   :  { %387 = vst [vmem:[%s625_s4 + $0x58] sm:$0xff] %v371_v37  ;;  %v232_v46 = vpop.f32.mrf.mxu0  ;;  %v264_v47 = vpop.f32.mrf.mxu1 }
  0xed   :  { %377 = vst [vmem:[%s625_s4 + $0x8] sm:$0xff] %v361_v42  ;;  %385 = vst [vmem:[%s625_s4 + $0x48] sm:$0xff] %v369_v43  ;;  %v366_v48 = vadd.f32 %v413_v18, %v343_v44  ;;  %v374_v49 = vadd.f32 %v413_v18, %v351_v45  ;;  %v341_v50 = vmul.f32 %v412_v16, %v232_v46 }
  0xee   :  { %v349_v51 = vmul.f32 %v412_v16, %v264_v47  ;;  %v453_v52 = vpop.f32.mrf.mxu0  ;;  %v461_v53 = vpop.f32.mrf.mxu1 }
  0xef   :  { %382 = vst [vmem:[%s625_s4 + $0x30] sm:$0xff] %v366_v48  ;;  %390 = vst [vmem:[%s625_s4 + $0x70] sm:$0xff] %v374_v49  ;;  %v364_v54 = vadd.f32 %v413_v18, %v341_v50  ;;  %v344_v56 = vmul.f32 %v453_v52, %v412_v16  ;;  %v352_v57 = vmul.f32 %v461_v53, %v412_v16 }
  0xf0   :  { %v372_v55 = vadd.f32 %v413_v18, %v349_v51  ;;  %v235_v58 = vpop.f32.mrf.mxu0  ;;  %v267_v59 = vpop.f32.mrf.mxu1 }
  0xf1   :  { %380 = vst [vmem:[%s625_s4 + $0x20] sm:$0xff] %v364_v54  ;;  %v367_v60 = vadd.f32 %v413_v18, %v344_v56  ;;  %v375_v61 = vadd.f32 %v413_v18, %v352_v57  ;;  %v342_v62 = vmul.f32 %v412_v16, %v235_v58  ;;  %v350_v63 = vmul.f32 %v412_v16, %v267_v59 }
  0xf2   :  { %388 = vst [vmem:[%s625_s4 + $0x60] sm:$0xff] %v372_v55 }
  0xf3   :  { %383 = vst [vmem:[%s625_s4 + $0x38] sm:$0xff] %v367_v60  ;;  %391 = vst [vmem:[%s625_s4 + $0x78] sm:$0xff] %v375_v61  ;;  %v365_v0 = vadd.f32 %v413_v18, %v342_v62  ;;  %v373_v1 = vadd.f32 %v413_v18, %v350_v63 }
  0xf5   :  { %381 = vst [vmem:[%s625_s4 + $0x28] sm:$0xff] %v365_v0  ;;  %389 = vst [vmem:[%s625_s4 + $0x68] sm:$0xff] %v373_v1 }

// kernel: residual_block.5
= control target key start
LH: loop header
LB: loop body
LE: loop exit
PB: predicated region body
PF: predicated region fallthrough
CT: control target
= control target key end

     0   :  { %s761_s1 = inlined_call_operand.vmem [shape: bf16[128,128], index: 1, kind: input, shape index: {}]   ;;  %s762_s0 = inlined_call_operand.vmem [shape: bf16[128,128], index: 0, kind: input, shape index: {}]   ;;  %s763_s2 = inlined_call_operand.vmem [shape: f32[1,128], index: 2, kind: input, shape index: {}]   ;;  %s764_s3 = inlined_call_operand.vmem [shape: f32[1,128], index: 3, kind: input, shape index: {}]   ;;  %s765_s4 = inlined_call_operand.vmem [shape: f32[128,128], index: 4, kind: input, shape index: {}]   ;;  %s766_s5 = inlined_call_operand.vmem [shape: f32[128,128], index: 5, kind: output, shape index: {}]  }
   0x1   :  { %v529_v0 = vld [vmem:[%s761_s1 + $0x38] sm:$0xff]   ;;  %v530_v1 = vld [vmem:[%s761_s1 + $0x30] sm:$0xff]   ;;  %v531_v2 = vld [vmem:[%s761_s1 + $0x28] sm:$0xff]  }
   0x2   :  { %481 = vmatprep.subr.bf16.mxu0 %v529_v0  ;;  %513 = vmatprep.subr.bf16.mxu1 %v529_v0  ;;  %v532_v3 = vld [vmem:[%s761_s1 + $0x20] sm:$0xff]   ;;  %v533_v6 = vld [vmem:[%s761_s1 + $0x18] sm:$0xff]   ;;  %v534_v7 = vld [vmem:[%s761_s1 + $0x10] sm:$0xff]  }
   0x3   :  { %482 = vmatpush3.bf16.msra.mxu0 %v529_v0  ;;  %521 = vmatpush3.bf16.msra.mxu1 %v529_v0  ;;  %v537_v4 = vld [vmem:[%s762_s0] sm:$0xff]   ;;  %v535_v8 = vld [vmem:[%s761_s1 + $0x8] sm:$0xff]   ;;  %v541_v12 = vld [vmem:[%s762_s0 + $0x10] sm:$0xff]  }
   0x4   :  { %483 = vmatprep.subr.bf16.mxu0 %v530_v1  ;;  %514 = vmatprep.subr.bf16.mxu1 %v530_v1  ;;  %v538_v5 = vld [vmem:[%s762_s0 + $0x20] sm:$0xff]   ;;  %v539_v10 = vld [vmem:[%s762_s0 + $0x8] sm:$0xff]   ;;  %v542_v13 = vld [vmem:[%s762_s0 + $0x30] sm:$0xff]  }
   0x5   :  { %497 = vmatprep.mubr.bf16.mxu0 %v537_v4  ;;  %505 = vmatprep.mubr.bf16.mxu1 %v538_v5  ;;  %v536_v9 = vld [vmem:[%s761_s1] sm:$0xff]   ;;  %v540_v11 = vld [vmem:[%s762_s0 + $0x28] sm:$0xff]   ;;  %v543_v14 = vld [vmem:[%s762_s0 + $0x18] sm:$0xff]  }
   0x6   :  { %v544_v15 = vld [vmem:[%s762_s0 + $0x38] sm:$0xff]   ;;  %v626_v16 = vld [vmem:[%s763_s2] ss:$0 sm:$0xff]  ;;  %v381_v22 = vld [vmem:[%s765_s4 + $0x10] sm:$0xff] }
   0x7   :  { %484 = vmatpush3.bf16.msra.mxu0 %v530_v1  ;;  %522 = vmatpush3.bf16.msra.mxu1 %v530_v1  ;;  %v631_v18 = vld [vmem:[%s764_s3] ss:$0 sm:$0xff]  ;;  %v389_v23 = vld [vmem:[%s765_s4 + $0x50] sm:$0xff]  ;;  %v382_v46 = vld [vmem:[%s765_s4 + $0x18] sm:$0xff] }
   0x8   :  { %485 = vmatprep.subr.bf16.mxu0 %v531_v2  ;;  %515 = vmatprep.subr.bf16.mxu1 %v531_v2  ;;  %v379_v30 = vld [vmem:[%s765_s4] sm:$0xff]  ;;  %v390_v47 = vld [vmem:[%s765_s4 + $0x58] sm:$0xff]  ;;  %v380_v56 = vld [vmem:[%s765_s4 + $0x8] sm:$0xff] }
   0x9   :  { %v387_v31 = vld [vmem:[%s765_s4 + $0x40] sm:$0xff]  ;;  %v388_v57 = vld [vmem:[%s765_s4 + $0x48] sm:$0xff]  ;;  %v385_v0 = vld [vmem:[%s765_s4 + $0x30] sm:$0xff] }
   0xa   :  { %v393_v1 = vld [vmem:[%s765_s4 + $0x70] sm:$0xff] }
   0xb   :  { %486 = vmatpush3.bf16.msra.mxu0 %v531_v2  ;;  %523 = vmatpush3.bf16.msra.mxu1 %v531_v2 }
   0xc   :  { %487 = vmatprep.subr.bf16.mxu0 %v532_v3  ;;  %516 = vmatprep.subr.bf16.mxu1 %v532_v3 }
   0xf   :  { %488 = vmatpush3.bf16.msra.mxu0 %v532_v3  ;;  %524 = vmatpush3.bf16.msra.mxu1 %v532_v3 }
  0x10   :  { %489 = vmatprep.subr.bf16.mxu0 %v533_v6  ;;  %517 = vmatprep.subr.bf16.mxu1 %v533_v6 }
  0x13   :  { %490 = vmatpush3.bf16.msra.mxu0 %v533_v6  ;;  %525 = vmatpush3.bf16.msra.mxu1 %v533_v6 }
  0x14   :  { %491 = vmatprep.subr.bf16.mxu0 %v534_v7  ;;  %518 = vmatprep.subr.bf16.mxu1 %v534_v7 }
  0x17   :  { %492 = vmatpush3.bf16.msra.mxu0 %v534_v7  ;;  %526 = vmatpush3.bf16.msra.mxu1 %v534_v7 }
  0x18   :  { %493 = vmatprep.subr.bf16.mxu0 %v535_v8  ;;  %519 = vmatprep.subr.bf16.mxu1 %v535_v8 }
  0x1b   :  { %494 = vmatpush3.bf16.msra.mxu0 %v535_v8  ;;  %527 = vmatpush3.bf16.msra.mxu1 %v535_v8 }
  0x1c   :  { %495 = vmatprep.subr.bf16.mxu0 %v536_v9  ;;  %520 = vmatprep.subr.bf16.mxu1 %v536_v9 }
  0x1f   :  { %496 = vmatpush3.bf16.msra.mxu0 %v536_v9  ;;  %528 = vmatpush3.bf16.msra.mxu1 %v536_v9 }
  0x22   :  { %498 = vmatmul.mubr.bf16.vlgmr.msra.gmra.mxu0 %v539_v10  ;;  %506 = vmatmul.mubr.bf16.vlgmr.msra.gmra.mxu1 %v540_v11 }
  0x23   :  { %501 = vmatprep.mubr.bf16.mxu0 %v541_v12  ;;  %509 = vmatprep.mubr.bf16.mxu1 %v542_v13  ;;  %v383_v12 = vld [vmem:[%s765_s4 + $0x20] sm:$0xff] }
  0x24   :  { %v391_v13 = vld [vmem:[%s765_s4 + $0x60] sm:$0xff] }
  0x2a   :  { %502 = vmatmul.mubr.bf16.gmra.mxu0 %v543_v14  ;;  %510 = vmatmul.mubr.bf16.gmra.mxu1 %v544_v15 }
  0xe2   :  { %v499_v17 = vpop.f32.mrf.mxu0  ;;  %v507_v19 = vpop.f32.mrf.mxu1 }
  0xe3   :  { %v342_v20 = vmul.f32 %v499_v17, %v626_v16  ;;  %v350_v21 = vmul.f32 %v507_v19, %v626_v16 }
  0xe4   :  { %v219_v24 = vpop.f32.mrf.mxu0  ;;  %v251_v25 = vpop.f32.mrf.mxu1 }
  0xe5   :  { %v365_v26 = vadd.f32 %v631_v18, %v342_v20  ;;  %v373_v27 = vadd.f32 %v631_v18, %v350_v21  ;;  %v340_v28 = vmul.f32 %v626_v16, %v219_v24  ;;  %v348_v29 = vmul.f32 %v626_v16, %v251_v25 }
  0xe6   :  { %v500_v32 = vpop.f32.mrf.mxu0  ;;  %v508_v33 = vpop.f32.mrf.mxu1 }
  0xe7   :  { %v397_v34 = vadd.f32 %v381_v22, %v365_v26  ;;  %v405_v35 = vadd.f32 %v389_v23, %v373_v27  ;;  %v363_v36 = vadd.f32 %v631_v18, %v340_v28  ;;  %v371_v37 = vadd.f32 %v631_v18, %v348_v29 }
  0xe8   :  { %v343_v38 = vmul.f32 %v500_v32, %v626_v16  ;;  %v351_v39 = vmul.f32 %v508_v33, %v626_v16  ;;  %v222_v40 = vpop.f32.mrf.mxu0  ;;  %v254_v41 = vpop.f32.mrf.mxu1  ;;  %v386_v32 = vld [vmem:[%s765_s4 + $0x38] sm:$0xff] }
  0xe9   :  { %v413_v42 = vmax.f32 %v397_v34, 0.0  ;;  %v421_v43 = vmax.f32 %v405_v35, 0.0  ;;  %v395_v44 = vadd.f32 %v379_v30, %v363_v36  ;;  %v403_v45 = vadd.f32 %v387_v31, %v371_v37  ;;  %v394_v33 = vld [vmem:[%s765_s4 + $0x78] sm:$0xff] }
  0xea   :  { %v366_v48 = vadd.f32 %v631_v18, %v343_v38  ;;  %v374_v49 = vadd.f32 %v631_v18, %v351_v39  ;;  %v341_v50 = vmul.f32 %v626_v16, %v222_v40  ;;  %v349_v51 = vmul.f32 %v626_v16, %v254_v41  ;;  %v503_v52 = vpop.f32.mrf.mxu0  ;;  %v511_v53 = vpop.f32.mrf.mxu1  ;;  %v384_v40 = vld [vmem:[%s765_s4 + $0x28] sm:$0xff] }
  0xeb   :  { %429 = vst [vmem:[%s766_s5 + $0x10] sm:$0xff] %v413_v42  ;;  %437 = vst [vmem:[%s766_s5 + $0x50] sm:$0xff] %v421_v43  ;;  %v411_v54 = vmax.f32 %v395_v44, 0.0  ;;  %v419_v55 = vmax.f32 %v403_v45, 0.0  ;;  %v346_v58 = vmul.f32 %v503_v52, %v626_v16  ;;  %v354_v59 = vmul.f32 %v511_v53, %v626_v16  ;;  %v392_v41 = vld [vmem:[%s765_s4 + $0x68] sm:$0xff] }
  0xec   :  { %v398_v60 = vadd.f32 %v382_v46, %v366_v48  ;;  %v406_v61 = vadd.f32 %v390_v47, %v374_v49  ;;  %v364_v62 = vadd.f32 %v631_v18, %v341_v50  ;;  %v372_v63 = vadd.f32 %v631_v18, %v349_v51  ;;  %v235_v2 = vpop.f32.mrf.mxu0  ;;  %v267_v3 = vpop.f32.mrf.mxu1 }
  0xed   :  { %427 = vst [vmem:[%s766_s5] sm:$0xff] %v411_v54  ;;  %435 = vst [vmem:[%s766_s5 + $0x40] sm:$0xff] %v419_v55  ;;  %v369_v4 = vadd.f32 %v631_v18, %v346_v58  ;;  %v377_v5 = vadd.f32 %v631_v18, %v354_v59  ;;  %v344_v6 = vmul.f32 %v626_v16, %v235_v2 }
  0xee   :  { %v352_v7 = vmul.f32 %v626_v16, %v267_v3  ;;  %v414_v8 = vmax.f32 %v398_v60, 0.0  ;;  %v422_v9 = vmax.f32 %v406_v61, 0.0  ;;  %v396_v10 = vadd.f32 %v380_v56, %v364_v62  ;;  %v504_v14 = vpop.f32.mrf.mxu0  ;;  %v512_v15 = vpop.f32.mrf.mxu1 }
  0xef   :  { %v404_v11 = vadd.f32 %v388_v57, %v372_v63  ;;  %v401_v17 = vadd.f32 %v385_v0, %v369_v4  ;;  %v409_v19 = vadd.f32 %v393_v1, %v377_v5  ;;  %v367_v20 = vadd.f32 %v631_v18, %v344_v6 }
  0xf0   :  { %v375_v21 = vadd.f32 %v631_v18, %v352_v7  ;;  %430 = vst [vmem:[%s766_s5 + $0x18] sm:$0xff] %v414_v8  ;;  %438 = vst [vmem:[%s766_s5 + $0x58] sm:$0xff] %v422_v9  ;;  %v412_v22 = vmax.f32 %v396_v10, 0.0  ;;  %v347_v24 = vmul.f32 %v504_v14, %v626_v16  ;;  %v355_v25 = vmul.f32 %v512_v15, %v626_v16  ;;  %v238_v26 = vpop.f32.mrf.mxu0  ;;  %v270_v27 = vpop.f32.mrf.mxu1 }
  0xf1   :  { %v420_v23 = vmax.f32 %v404_v11, 0.0  ;;  %v417_v28 = vmax.f32 %v401_v17, 0.0  ;;  %v425_v29 = vmax.f32 %v409_v19, 0.0  ;;  %v399_v30 = vadd.f32 %v383_v12, %v367_v20 }
  0xf2   :  { %v407_v31 = vadd.f32 %v391_v13, %v375_v21  ;;  %428 = vst [vmem:[%s766_s5 + $0x8] sm:$0xff] %v412_v22  ;;  %v370_v34 = vadd.f32 %v631_v18, %v347_v24  ;;  %v378_v35 = vadd.f32 %v631_v18, %v355_v25  ;;  %v345_v36 = vmul.f32 %v626_v16, %v238_v26 }
  0xf3   :  { %436 = vst [vmem:[%s766_s5 + $0x48] sm:$0xff] %v420_v23  ;;  %v353_v37 = vmul.f32 %v626_v16, %v270_v27  ;;  %433 = vst [vmem:[%s766_s5 + $0x30] sm:$0xff] %v417_v28  ;;  %v415_v38 = vmax.f32 %v399_v30, 0.0 }
  0xf4   :  { %441 = vst [vmem:[%s766_s5 + $0x70] sm:$0xff] %v425_v29  ;;  %v423_v39 = vmax.f32 %v407_v31, 0.0  ;;  %v402_v42 = vadd.f32 %v386_v32, %v370_v34  ;;  %v410_v16 = vadd.f32 %v394_v33, %v378_v35  ;;  %v368_v43 = vadd.f32 %v631_v18, %v345_v36 }
  0xf5   :  { %v376_v44 = vadd.f32 %v631_v18, %v353_v37  ;;  %431 = vst [vmem:[%s766_s5 + $0x20] sm:$0xff] %v415_v38 }
  0xf6   :  { %439 = vst [vmem:[%s766_s5 + $0x60] sm:$0xff] %v423_v39  ;;  %v418_v45 = vmax.f32 %v402_v42, 0.0  ;;  %v426_v46 = vmax.f32 %v410_v16, 0.0  ;;  %v400_v47 = vadd.f32 %v384_v40, %v368_v43 }
  0xf7   :  { %v408_v48 = vadd.f32 %v392_v41, %v376_v44 }
  0xf8   :  { %434 = vst [vmem:[%s766_s5 + $0x38] sm:$0xff] %v418_v45  ;;  %442 = vst [vmem:[%s766_s5 + $0x78] sm:$0xff] %v426_v46  ;;  %v416_v18 = vmax.f32 %v400_v47, 0.0 }
  0xf9   :  { %v424_v49 = vmax.f32 %v408_v48, 0.0 }
  0xfa   :  { %432 = vst [vmem:[%s766_s5 + $0x28] sm:$0xff] %v416_v18 }
  0xfb   :  { %440 = vst [vmem:[%s766_s5 + $0x68] sm:$0xff] %v424_v49 }

</bundles_post_ra>
